<compile_context>
chip_gen: v5e
topology: v5e:2x2
jax: 0.10.0
libtpu: 0.0.40
codegen_flags: <defaults>
</compile_context>

<pallas_src>
import jax
import jax.numpy as jnp
from jax.experimental import pallas as pl
from jax.experimental.pallas import tpu as pltpu


def policy_mlp_kernel(x_ref, w1_ref, b1_ref, w2_ref, b2_ref, out_ref):
    # x tile: (tb, S) f32; weights/biases resident in VMEM across the grid.
    x = x_ref[...]

    # fc1 + ReLU (f32 accumulation on the MXU, elementwise epilogue in f32).
    h = jnp.dot(x, w1_ref[...], preferred_element_type=jnp.float32)      # (tb, H)
    h = jnp.maximum(h + b1_ref[...], 0.0)

    # fc2.
    logits = jnp.dot(h, w2_ref[...], preferred_element_type=jnp.float32)  # (tb, A)
    logits = logits + b2_ref[...]

    # Numerically stable softmax over the last axis with an EXACT divide
    # (kernel is memory-bound, the divide is free; rows sum to 1 in f32).
    m = jnp.max(logits, axis=-1, keepdims=True)
    e = jnp.exp(logits - m)
    denom = jnp.sum(e, axis=-1, keepdims=True)
    out_ref[...] = (e / denom).astype(out_ref.dtype)


def policy_mlp_forward(x, w1, b1, w2, b2, *, block_b=8192):
    """x: (B, S) f32; w1: (S, H); b1: (1, H); w2: (H, A); b2: (1, A). Returns (B, A) f32."""
    B, S = x.shape
    H = w1.shape[1]
    A = w2.shape[1]

    # Batch tile: big (8192) for large B to amortize per-step overhead; for small
    # B use one tile rounded up to the 8-sublane granule.  No wrapper-side pad or
    # output slice: Pallas masks the partial boundary block on HBM writeback.
    if B >= block_b:
        tb = block_b
    else:
        tb = max(8, ((B + 7) // 8) * 8)
    grid = (pl.cdiv(B, tb),)

    bytes_accessed = (B * S * 4                    # x (f32, streamed)
                      + S * H * 4 + H * 4          # w1 + b1 (resident)
                      + H * A * 4 + A * 4          # w2 + b2 (resident)
                      + B * A * 4)                 # out (f32)
    cost = pl.CostEstimate(
        flops=2 * B * (S * H + H * A),
        transcendentals=B * A,
        bytes_accessed=bytes_accessed,
    )

    return pl.pallas_call(
        policy_mlp_kernel,
        out_shape=jax.ShapeDtypeStruct((B, A), jnp.float32),
        grid=grid,
        in_specs=[
            pl.BlockSpec((tb, S), lambda i: (i, 0)),   # x: streamed per batch tile
            pl.BlockSpec((S, H), lambda i: (0, 0)),    # w1: resident
            pl.BlockSpec((1, H), lambda i: (0, 0)),    # b1: resident
            pl.BlockSpec((H, A), lambda i: (0, 0)),    # w2: resident
            pl.BlockSpec((1, A), lambda i: (0, 0)),    # b2: resident
        ],
        out_specs=pl.BlockSpec((tb, A), lambda i: (i, 0)),
        compiler_params=pltpu.CompilerParams(
            dimension_semantics=("parallel",),         # megacore / dual-TC on v7x
        ),
        cost_estimate=cost,
    )(x, w1, b1, w2, b2)


def init_params(key, state_dim, action_dim, hidden_dim):
    # Mirrors torch nn.Linear default init: U(-1/sqrt(fan_in), 1/sqrt(fan_in)).
    # Weights stored transposed vs torch, i.e. (in_features, out_features).
    k1, k2, k3, k4 = jax.random.split(key, 4)
    lim1 = 1.0 / (state_dim ** 0.5)
    lim2 = 1.0 / (hidden_dim ** 0.5)
    w1 = jax.random.uniform(k1, (state_dim, hidden_dim), jnp.float32, -lim1, lim1)
    b1 = jax.random.uniform(k2, (1, hidden_dim), jnp.float32, -lim1, lim1)
    w2 = jax.random.uniform(k3, (hidden_dim, action_dim), jnp.float32, -lim2, lim2)
    b2 = jax.random.uniform(k4, (1, action_dim), jnp.float32, -lim2, lim2)
    return w1, b1, w2, b2


def _reference(x, w1, b1, w2, b2):
    # Pure-JAX f32 reference matching the PyTorch module.
    h = jnp.maximum(x @ w1 + b1, 0.0)
    logits = h @ w2 + b2
    return jax.nn.softmax(logits, axis=-1)


if __name__ == "__main__":
    state_dim, action_dim, hidden_dim = 16, 8, 32

    key = jax.random.PRNGKey(0)
    kx, kp = jax.random.split(key)
    w1, b1, w2, b2 = init_params(kp, state_dim, action_dim, hidden_dim)

    # Case 1: small batch, single tile.
    B = 8
    x = jax.random.normal(kx, (B, state_dim), jnp.float32)
    prob = policy_mlp_forward(x, w1, b1, w2, b2)
    jax.block_until_ready(prob)
    prob_ref = _reference(x, w1, b1, w2, b2)
    assert prob.shape == (B, action_dim)
    assert jnp.allclose(prob, prob_ref, atol=5e-3, rtol=1e-2)
    # Exact divide -> rows sum to 1 to f32 precision.
    assert jnp.allclose(jnp.sum(prob, axis=-1), 1.0, atol=1e-4)

    # Case 2: multi-tile grid with a ragged (partial) last tile — no pad / slice.
    B2 = 20
    x2 = jax.random.normal(jax.random.PRNGKey(1), (B2, state_dim), jnp.float32)
    prob2 = policy_mlp_forward(x2, w1, b1, w2, b2, block_b=8)
    jax.block_until_ready(prob2)
    prob2_ref = _reference(x2, w1, b1, w2, b2)
    assert prob2.shape == (B2, action_dim)
    assert jnp.allclose(prob2, prob2_ref, atol=5e-3, rtol=1e-2)
    assert jnp.allclose(jnp.sum(prob2, axis=-1), 1.0, atol=1e-4)

    print("KERNEL_OK")
</pallas_src>

<mosaic_0001>
module attributes {stable_mosaic.version = 11 : i64} {
  func.func @policy_mlp_kernel(%arg0: i32, %arg1: memref<8x16xf32, #tpu.memory_space<vmem>>, %arg2: memref<16x32xf32, #tpu.memory_space<vmem>>, %arg3: memref<1x32xf32, #tpu.memory_space<vmem>>, %arg4: memref<32x8xf32, #tpu.memory_space<vmem>>, %arg5: memref<1x8xf32, #tpu.memory_space<vmem>>, %arg6: memref<8x8xf32, #tpu.memory_space<vmem>>) attributes {dimension_semantics = [#tpu.dimension_semantics<parallel>], iteration_bounds = array<i64: 1>, scalar_prefetch = 0 : i64, scratch_operands = 0 : i64, tpu.core_type = #tpu.core_type<tc>, window_params = [{transform_indices = @transform_0, window_bounds = array<i64: 8, 16>}, {pipeline_mode = #tpu.pipeline_mode<synchronous>, transform_indices = @transform_1, window_bounds = array<i64: 16, 32>}, {pipeline_mode = #tpu.pipeline_mode<synchronous>, transform_indices = @transform_2, window_bounds = array<i64: 1, 32>}, {pipeline_mode = #tpu.pipeline_mode<synchronous>, transform_indices = @transform_3, window_bounds = array<i64: 32, 8>}, {pipeline_mode = #tpu.pipeline_mode<synchronous>, transform_indices = @transform_4, window_bounds = array<i64: 1, 8>}, {transform_indices = @transform_5, window_bounds = array<i64: 8, 8>}]} {
    %c0 = arith.constant 0 : index
    %c0_0 = arith.constant 0 : index
    %0 = vector.load %arg1[%c0, %c0_0] : memref<8x16xf32, #tpu.memory_space<vmem>>, vector<8x16xf32>
    %c0_1 = arith.constant 0 : index
    %c0_2 = arith.constant 0 : index
    %1 = vector.load %arg2[%c0_1, %c0_2] : memref<16x32xf32, #tpu.memory_space<vmem>>, vector<16x32xf32>
    %cst = arith.constant dense<0.000000e+00> : vector<8x32xf32>
    %2 = tpu.matmul %0, %1, %cst {dimension_numbers = #tpu.dot_dimension_numbers<[1], [0], [0], [1], [0, 0, 1, 1], [], []>} : vector<8x16xf32>, vector<16x32xf32>, vector<8x32xf32> -> vector<8x32xf32>
    %c0_3 = arith.constant 0 : index
    %c0_4 = arith.constant 0 : index
    %3 = vector.load %arg3[%c0_3, %c0_4] : memref<1x32xf32, #tpu.memory_space<vmem>>, vector<1x32xf32>
    %4 = vector.broadcast %3 : vector<1x32xf32> to vector<8x32xf32>
    %5 = arith.addf %2, %4 : vector<8x32xf32>
    %cst_5 = arith.constant 0.000000e+00 : f32
    %6 = vector.broadcast %cst_5 : f32 to vector<8x32xf32>
    %7 = arith.maximumf %5, %6 : vector<8x32xf32>
    %c0_6 = arith.constant 0 : index
    %c0_7 = arith.constant 0 : index
    %8 = vector.load %arg4[%c0_6, %c0_7] : memref<32x8xf32, #tpu.memory_space<vmem>>, vector<32x8xf32>
    %cst_8 = arith.constant dense<0.000000e+00> : vector<8x8xf32>
    %9 = tpu.matmul %7, %8, %cst_8 {dimension_numbers = #tpu.dot_dimension_numbers<[1], [0], [0], [1], [0, 0, 1, 1], [], []>} : vector<8x32xf32>, vector<32x8xf32>, vector<8x8xf32> -> vector<8x8xf32>
    %c0_9 = arith.constant 0 : index
    %c0_10 = arith.constant 0 : index
    %10 = vector.load %arg5[%c0_9, %c0_10] : memref<1x8xf32, #tpu.memory_space<vmem>>, vector<1x8xf32>
    %11 = vector.broadcast %10 : vector<1x8xf32> to vector<8x8xf32>
    %12 = arith.addf %9, %11 : vector<8x8xf32>
    %cst_11 = arith.constant dense<0xFF800000> : vector<8xf32>
    %13 = vector.multi_reduction <maximumf>, %12, %cst_11 [1] : vector<8x8xf32> to vector<8xf32>
    %14 = vector.shape_cast %13 : vector<8xf32> to vector<8x1xf32>
    %15 = vector.broadcast %14 : vector<8x1xf32> to vector<8x8xf32>
    %16 = arith.subf %12, %15 : vector<8x8xf32>
    %17 = math.exp %16 : vector<8x8xf32>
    %cst_12 = arith.constant dense<0.000000e+00> : vector<8xf32>
    %18 = vector.multi_reduction <add>, %17, %cst_12 [1] : vector<8x8xf32> to vector<8xf32>
    %19 = vector.shape_cast %18 : vector<8xf32> to vector<8x1xf32>
    %20 = vector.broadcast %19 : vector<8x1xf32> to vector<8x8xf32>
    %21 = arith.divf %17, %20 : vector<8x8xf32>
    %c0_13 = arith.constant 0 : index
    %c0_14 = arith.constant 0 : index
    %22 = vector.load %arg6[%c0_13, %c0_14] : memref<8x8xf32, #tpu.memory_space<vmem>>, vector<8x8xf32>
    tpu.vector_store %arg6[%c0_13, %c0_14], %21 {strides = array<i32>} : memref<8x8xf32, #tpu.memory_space<vmem>>, vector<8x8xf32>,
    return
  }
  func.func @transform_0(%arg0: i32) -> (i32, i32) {
    %c0_i32 = arith.constant 0 : i32
    %c0_i32_0 = arith.constant 0 : i32
    return %arg0, %c0_i32 : i32, i32
  }
  func.func @transform_1(%arg0: i32) -> (i32, i32) {
    %c0_i32 = arith.constant 0 : i32
    %c0_i32_0 = arith.constant 0 : i32
    %c0_i32_1 = arith.constant 0 : i32
    return %c0_i32, %c0_i32_0 : i32, i32
  }
  func.func @transform_2(%arg0: i32) -> (i32, i32) {
    %c0_i32 = arith.constant 0 : i32
    %c0_i32_0 = arith.constant 0 : i32
    %c0_i32_1 = arith.constant 0 : i32
    return %c0_i32, %c0_i32_0 : i32, i32
  }
  func.func @transform_3(%arg0: i32) -> (i32, i32) {
    %c0_i32 = arith.constant 0 : i32
    %c0_i32_0 = arith.constant 0 : i32
    %c0_i32_1 = arith.constant 0 : i32
    return %c0_i32, %c0_i32_0 : i32, i32
  }
  func.func @transform_4(%arg0: i32) -> (i32, i32) {
    %c0_i32 = arith.constant 0 : i32
    %c0_i32_0 = arith.constant 0 : i32
    %c0_i32_1 = arith.constant 0 : i32
    return %c0_i32, %c0_i32_0 : i32, i32
  }
  func.func @transform_5(%arg0: i32) -> (i32, i32) {
    %c0_i32 = arith.constant 0 : i32
    %c0_i32_0 = arith.constant 0 : i32
    return %arg0, %c0_i32 : i32, i32
  }
}

</mosaic_0001>

<bundles_post_ra>
// kernel: tpu_custom_call.1
= control target key start
LH: loop header
LB: loop body
LE: loop exit
PB: predicated region body
PF: predicated region fallthrough
CT: control target
= control target key end

     0   :  { %vm28_vm0 = vcmask 130048   ;;  %s226_s0 = inlined_call_operand.vmem [shape: f32[8,16], index: 0, kind: input, shape index: {}]   ;;  %s227_s1 = inlined_call_operand.vmem [shape: f32[16,32], index: 1, kind: input, shape index: {}]   ;;  %s228_s2 = inlined_call_operand.vmem [shape: f32[1,32], index: 2, kind: input, shape index: {}]   ;;  %s229_s3 = inlined_call_operand.vmem [shape: f32[32,8], index: 3, kind: input, shape index: {}]   ;;  %s230_s4 = inlined_call_operand.vmem [shape: f32[1,8], index: 4, kind: input, shape index: {}]   ;;  %s231_s5 = inlined_call_operand.hbm [shape: f32[8,8], index: 5, kind: output, shape index: {}]  }
   0x1   :  { %v23_v0 = vld [vmem:[%s227_s1 + $0x8] sm:$0xff]  ;;  %v22_v1 = vld [vmem:[%s227_s1] sm:$0xff]  ;;  %v56_v3 = vld [vmem:[%s229_s3 + $0x18] sm:$0xff] }
   0x2   :  { %46 = vmatpush.msra.mxu0 %v23_v0  ;;  %v21_v2 = vld [vmem:[%s226_s0] sm:$0xff]  ;;  %77 = vmatpush.msra.mxu1 %v56_v3 }
   0x3   :  { %10 = vsyncpa [#allocation3], 0  ;;  %v55_v4 = vld [vmem:[%s229_s3 + $0x10] sm:$0xff]  ;;  %v54_v5 = vld [vmem:[%s229_s3 + $0x8] sm:$0xff]  ;;  %vm61_vm1 = vcmask 261120   ;;  %vm85_vm2 = vcmask 64512  }
   0x4   :  { %47 = vmatpush.msra.mxu0 %v22_v1  ;;  %78 = vmatpush.msra.mxu1 %v55_v4  ;;  %v53_v6 = vld [vmem:[%s229_s3] sm:$0xff]  ;;  %s118_s10 = sshll.u32 %s231_s5, 4  ;;  %s119_s10 = int_to_ptr.hbm [resolvable:$true] %s118_s10 }
   0x5   :  { %127 = vmatmul.msk.f32.vlgmr.msra.gmra.mxu0 %vm28_vm0, %v21_v2  ;;  %v130_v7 = vld [vmem:[%s228_s2] ss:$0 sm:$0xff]  ;;  %s162_s2 = smov [#allocation2]  }
   0x6   :  { %79 = vmatpush.msra.mxu1 %v54_v5  ;;  %v131_v11 = vld [vmem:[%s230_s4] ss:$0 sm:$0xff]  ;;  %s116_s3 = sshll.u32 %s162_s2, 4  ;;  %s117_s3 = int_to_ptr.vmem [resolvable:$true] %s116_s3 }
   0x8   :  { %80 = vmatpush.msra.mxu1 %v53_v6 }
  0x82   :  { %v49_v8 = vpop.f32.mrf.mxu0 }
  0x83   :  { %v50_v9 = vadd.f32 %v130_v7, %v49_v8 }
  0x85   :  { %v52_v10 = vmax.f32 %v50_v9, 0.0 }
  0x87   :  { %128 = vmatmul.msk.f32.vlgmr.msra.gmra.mxu1 %vm61_vm1, %v52_v10 }
 0x104   :  { %v82_v12 = vpop.f32.mrf.mxu1 }
 0x105   :  { %v83_v13 = vadd.f32 %v131_v11, %v82_v12 }
 0x107   :  { %v86_v14 = vsel %vm85_vm2, %v83_v13, -inf }
 0x108   :  { %87 = vmax.xlane.f32.xlu0 %v86_v14 }
 0x17b   :  { %v88_v15 = vpop.xlane.xlu0 %87 }
 0x17c   :  { %v89_v16 = vsub.f32 %v83_v13, %v88_v15 }
 0x17e   :  { %v90_v17 = vmul.f32 1.442695, %v89_v16 }
 0x180   :  { %132 = vpow2.f32 %v90_v17 }
 0x186   :  { %v133_v18 = vpop.eup %132 }
 0x187   :  { %v92_v19 = vsel %vm85_vm2, %v133_v18, 0.0 }
 0x188   :  { %93 = vadd.xlane.f32.xlu0 %v92_v19 }
 0x1fb   :  { %v94_v20 = vpop.xlane.xlu0 %93 }
 0x1fc   :  { %134 = vrcp.f32 %v94_v20  ;;  %v106_v24 = vand.u32 2147483648, %v94_v20  ;;  %v104_v26 = vand.u32 2147483647, %v94_v20  ;;  %vm100_vm4 = vweird.f32 %v94_v20 }
 0x1fe   :  { %v107_v28 = vor.u32 1.1754944e-38, %v106_v24  ;;  %vm105_vm6 = vcmp.eq.f32.partialorder %v104_v26, 8.507059e+37 }
 0x202   :  { %v135_v21 = vpop.eup %134 }
 0x203   :  { %v96_v22 = vmul.f32 %v135_v21, %v94_v20  ;;  %vm101_vm3 = vweird.f32 %v135_v21 }
 0x204   :  { %vm102_vm5 = vmor %vm100_vm4, %vm101_vm3 }
 0x205   :  { %v97_v23 = vsub.f32 1.0, %v96_v22 }
 0x207   :  { %v98_v25 = vmul.f32 %v135_v21, %v97_v23 }
 0x209   :  { %v99_v27 = vadd.f32 %v135_v21, %v98_v25 }
 0x20b   :  { %v103_v29 = vsel %vm102_vm5, %v135_v21, %v99_v27 }
 0x20c   :  { %v108_v30 = vsel %vm105_vm6, %v107_v28, %v103_v29 }
 0x20d   :  { %v109_v31 = vmul.f32 %v133_v18, %v108_v30 }
 0x20f   :  { %110 = vst.msk [vmem:[#allocation2] sm:$0xff] %vm85_vm2, %v109_v31 }
 0x210   :  { %121 = dma.vmem_to_hbm [thread:$0]  %s117_s3, 128, %s119_s10, [#allocation3]  }
 0x211   :  { %160 = dma.done.wait [#allocation3], 128  }
 0x212   :  { %161 = vsyncadd [#allocation3], 4294967168 }
 0x213   :  { %126 = vsyncpa [#allocation3], 1 }

</bundles_post_ra>
